<compile_context>
chip_gen: v7x
topology: tpu7x:2x2x1
jax: 0.10.0
libtpu: 0.0.40
codegen_flags: <defaults>
</compile_context>

<pallas_src>
import jax
import jax.numpy as jnp
from jax.experimental import pallas as pl
from jax.experimental.pallas import tpu as pltpu

OHEM_RATIO = 3
LANE = 128
SUBLANE = 8
_VMEM_TILE_BUDGET = 12 * 1024 * 1024   # bytes for the 6 double-buffered input tiles


def _round_up(x, m):
    return (x + m - 1) // m * m


def _round_down(x, m):
    return (x // m) * m


# --------------------------------------------------------------------------
# Pallas kernel: global / per-batch streaming sums
# --------------------------------------------------------------------------
def _sum_hw(x):
    # (B, TR, 128) -> (B, 1, 1).  Sublane axis first (mostly VPU vreg adds),
    # lane axis last (one XLU lane-reduce per batch row).
    return jnp.sum(jnp.sum(x, axis=1, keepdims=True), axis=2, keepdims=True)


def _pan_sums_kernel(seg_ref, lab_ref, sel_ref, dns_ref, dtg_ref, tms_ref,
                     a_ref, b_ref, c_ref, abs_ref, m_ref):
    """Accumulates, per batch row b:
         a_ref   : sum_j (sigmoid(seg)*sel) * (binarize(lab)*sel)
         b_ref   : sum_j (sigmoid(seg)*sel)^2
         c_ref   : sum_j (binarize(lab)*sel)^2
         abs_ref : sum_j |densitys - sigmoid(dens)|
         m_ref   : sum_j training_mask
       Output refs are (B, 1, 1) f32 accumulators, resident across the grid."""
    k = pl.program_id(0)

    @pl.when(k == 0)
    def _init():
        a_ref[...] = jnp.zeros_like(a_ref)
        b_ref[...] = jnp.zeros_like(b_ref)
        c_ref[...] = jnp.zeros_like(c_ref)
        abs_ref[...] = jnp.zeros_like(abs_ref)
        m_ref[...] = jnp.zeros_like(m_ref)

    # Single fused pass: every input element is read from VMEM exactly once.
    sig_seg = jax.nn.sigmoid(seg_ref[...].astype(jnp.float32))      # (B, TR, 128)
    sel = sel_ref[...].astype(jnp.float32)
    tgt = jnp.where(lab_ref[...].astype(jnp.float32) > 0.5, 1.0, 0.0)
    im = sig_seg * sel
    tm = tgt * sel
    a_ref[...] += _sum_hw(im * tm)
    b_ref[...] += _sum_hw(im * im)
    c_ref[...] += _sum_hw(tm * tm)

    sig_dens = jax.nn.sigmoid(dns_ref[...].astype(jnp.float32))
    abs_ref[...] += _sum_hw(jnp.abs(dtg_ref[...].astype(jnp.float32) - sig_dens))
    m_ref[...] += _sum_hw(tms_ref[...].astype(jnp.float32))


def _pan_partial_sums(pred_seg, labels, selected, pred_dens, densitys, tmasks):
    """All inputs are (B, HW); returns five (B,) f32 partial-sum vectors."""
    B, HW = pred_seg.shape
    inputs = (pred_seg, labels, selected, pred_dens, densitys, tmasks)
    itemsize = max(jnp.dtype(x.dtype).itemsize for x in inputs)

    # View as (B, rows, 128) with rows padded to a multiple of the tile rows.
    rows = _round_up(HW, LANE) // LANE
    # Tile rows from the VMEM budget (6 inputs, double-buffered, f32 worst case).
    tr = _VMEM_TILE_BUDGET // (6 * 2 * B * LANE * 4)
    tr = max(SUBLANE, min(_round_down(max(tr, SUBLANE), SUBLANE), 2048))
    rows_pad = _round_up(max(rows, SUBLANE), SUBLANE)
    tr = min(tr, rows_pad)
    rows_pad = _round_up(rows_pad, tr)
    num_tiles = rows_pad // tr
    total = rows_pad * LANE                      # padded HW per batch row

    def _prep(x, pad_value):
        if total != HW:
            x = jnp.pad(x, ((0, 0), (0, total - HW)), constant_values=pad_value)
        return x.reshape(B, rows_pad, LANE)

    seg = _prep(pred_seg, 0.0)
    lab = _prep(labels, 0.0)
    sel = _prep(selected, 0.0)          # sel == 0 kills padded dice terms
    dns = _prep(pred_dens, -1e9)        # sigmoid(-1e9) == 0 exactly in f32
    dtg = _prep(densitys, 0.0)          # |0 - 0| == 0
    tms = _prep(tmasks, 0.0)

    in_spec = pl.BlockSpec((B, tr, LANE), lambda k: (0, k, 0))
    out_spec = pl.BlockSpec((B, 1, 1), lambda k: (0, 0, 0))   # resident accumulator
    out_sds = jax.ShapeDtypeStruct((B, 1, 1), jnp.float32)

    sums = pl.pallas_call(
        _pan_sums_kernel,
        grid=(num_tiles,),
        in_specs=[in_spec] * 6,
        out_specs=(out_spec,) * 5,
        out_shape=(out_sds,) * 5,
        compiler_params=pltpu.CompilerParams(
            dimension_semantics=("arbitrary",),
            vmem_limit_bytes=64 * 1024 * 1024),
        cost_estimate=pl.CostEstimate(
            flops=int(14 * B * total),
            transcendentals=int(2 * B * total),
            bytes_accessed=int(6 * B * total * itemsize)),
    )(seg, lab, sel, dns, dtg, tms)

    return tuple(s.reshape(B) for s in sums)


# --------------------------------------------------------------------------
# OHEM (plain JAX glue; the PyTorch original runs this on CPU / numpy)
# --------------------------------------------------------------------------
def _ohem_batch(scores, gt_texts, training_masks, ohem_ratio=OHEM_RATIO):
    # TODO(synk): the per-sample sort/threshold OHEM has no clean Pallas equivalent; it stays in XLA glue.
    B = scores.shape[0]
    scores = scores.reshape(B, -1).astype(jnp.float32)
    gts = gt_texts.reshape(B, -1).astype(jnp.float32)
    tms = training_masks.reshape(B, -1).astype(jnp.float32)

    def single(score, gt, tm):
        pos = gt > 0.5
        pos_num = jnp.sum(pos) - jnp.sum(pos & (tm <= 0.5))
        neg = jnp.logical_not(pos)
        neg_total = jnp.sum(neg)
        neg_num = jnp.minimum(pos_num * ohem_ratio, neg_total)
        neg_scores = jnp.where(neg, score, -jnp.inf)
        sorted_desc = -jnp.sort(-neg_scores)          # negatives, descending
        idx = jnp.clip(neg_num - 1, 0, score.shape[0] - 1)
        threshold = sorted_desc[idx]
        selected = ((score >= threshold) | pos) & (tm > 0.5)
        use_tm = jnp.logical_or(pos_num == 0, neg_num == 0)
        return jnp.where(use_tm, tm, selected.astype(jnp.float32))

    return jax.vmap(single)(scores, gts, tms)


# --------------------------------------------------------------------------
# Full forward
# --------------------------------------------------------------------------
@jax.jit
def pan_loss(outputs, labels, densitys, training_masks):
    """PANLoss.forward -> (loss, seg_texts, dens_loss)."""
    B, _, H, W = outputs.shape
    HW = H * W
    pred_seg = outputs[:, 0, :, :].reshape(B, HW)
    pred_dens = outputs[:, 1, :, :].reshape(B, HW)
    labels2 = labels.reshape(B, HW)
    densitys2 = densitys.reshape(B, HW)
    tmasks2 = training_masks.reshape(B, HW)

    selected = _ohem_batch(pred_seg, labels2, tmasks2)

    a, b, c, abs_sum, m_sum = _pan_partial_sums(
        pred_seg, labels2, selected, pred_dens, densitys2, tmasks2)

    # dice_loss: 1 - 2a / ((b + 1e-3) + (c + 1e-3)), averaged over the batch.
    dice = 1.0 - 2.0 * a / ((b + 0.001) + (c + 0.001))
    seg_texts = jnp.mean(dice)

    # regress_loss: mean(|densitys - sigmoid(pred_dens)|) * mask, then mean().
    n = float(B * HW)
    dens_loss = (jnp.sum(abs_sum) / n) * (jnp.sum(m_sum) / n)

    loss = seg_texts + dens_loss
    return loss, seg_texts, dens_loss


# --------------------------------------------------------------------------
# Pure-JAX reference reproducing the PyTorch forward
# --------------------------------------------------------------------------
def _reference(outputs, labels, densitys, training_masks):
    B, _, H, W = outputs.shape
    pred_seg = outputs[:, 0, :, :].astype(jnp.float32)
    pred_dens = outputs[:, 1, :, :].astype(jnp.float32)
    sel = _ohem_batch(pred_seg, labels, training_masks).reshape(B, -1)

    inp = jax.nn.sigmoid(pred_seg).reshape(B, -1) * sel
    tgt = (labels.astype(jnp.float32) > 0.5).astype(jnp.float32).reshape(B, -1) * sel
    a = jnp.sum(inp * tgt, axis=1)
    b = jnp.sum(inp * inp, axis=1) + 0.001
    c = jnp.sum(tgt * tgt, axis=1) + 0.001
    seg_texts = jnp.mean(1.0 - 2.0 * a / (b + c))

    dens_loss = (jnp.mean(jnp.abs(densitys.astype(jnp.float32)
                                  - jax.nn.sigmoid(pred_dens)))
                 * jnp.mean(training_masks.astype(jnp.float32)))
    loss = seg_texts + dens_loss
    return loss, seg_texts, dens_loss


if __name__ == "__main__":
    B, H, W = 2, 16, 16
    key = jax.random.PRNGKey(0)
    k1, k2, k3, k4 = jax.random.split(key, 4)
    outputs = jax.random.normal(k1, (B, 2, H, W), dtype=jnp.float32)
    labels = (jax.random.uniform(k2, (B, H, W)) > 0.5).astype(jnp.float32)
    densitys = jax.random.uniform(k3, (B, H, W), dtype=jnp.float32)
    training_masks = (jax.random.uniform(k4, (B, H, W)) > 0.1).astype(jnp.float32)

    loss, seg_texts, dens_loss = pan_loss(outputs, labels, densitys, training_masks)
    loss = jax.block_until_ready(loss)
    seg_texts = jax.block_until_ready(seg_texts)
    dens_loss = jax.block_until_ready(dens_loss)

    loss_r, seg_r, dens_r = _reference(outputs, labels, densitys, training_masks)
    assert jnp.allclose(seg_texts, seg_r, rtol=1e-4, atol=1e-4), (seg_texts, seg_r)
    assert jnp.allclose(dens_loss, dens_r, rtol=1e-4, atol=1e-4), (dens_loss, dens_r)
    assert jnp.allclose(loss, loss_r, rtol=1e-4, atol=1e-4), (loss, loss_r)

    print("KERNEL_OK")
</pallas_src>

<mosaic_0001>
module attributes {stable_mosaic.version = 11 : i64} {
  func.func @_pan_sums_kernel(%arg0: i32, %arg1: memref<2x8x128xf32, #tpu.memory_space<vmem>>, %arg2: memref<2x8x128xf32, #tpu.memory_space<vmem>>, %arg3: memref<2x8x128xf32, #tpu.memory_space<vmem>>, %arg4: memref<2x8x128xf32, #tpu.memory_space<vmem>>, %arg5: memref<2x8x128xf32, #tpu.memory_space<vmem>>, %arg6: memref<2x8x128xf32, #tpu.memory_space<vmem>>, %arg7: memref<2x1x1xf32, #tpu.memory_space<vmem>>, %arg8: memref<2x1x1xf32, #tpu.memory_space<vmem>>, %arg9: memref<2x1x1xf32, #tpu.memory_space<vmem>>, %arg10: memref<2x1x1xf32, #tpu.memory_space<vmem>>, %arg11: memref<2x1x1xf32, #tpu.memory_space<vmem>>) attributes {dimension_semantics = [#tpu.dimension_semantics<arbitrary>], iteration_bounds = array<i64: 1>, scalar_prefetch = 0 : i64, scratch_operands = 0 : i64, tpu.core_type = #tpu.core_type<tc>, window_params = [{transform_indices = @transform_0, window_bounds = array<i64: 2, 8, 128>}, {transform_indices = @transform_1, window_bounds = array<i64: 2, 8, 128>}, {transform_indices = @transform_2, window_bounds = array<i64: 2, 8, 128>}, {transform_indices = @transform_3, window_bounds = array<i64: 2, 8, 128>}, {transform_indices = @transform_4, window_bounds = array<i64: 2, 8, 128>}, {transform_indices = @transform_5, window_bounds = array<i64: 2, 8, 128>}, {pipeline_mode = #tpu.pipeline_mode<synchronous>, transform_indices = @transform_6, window_bounds = array<i64: 2, 1, 1>}, {pipeline_mode = #tpu.pipeline_mode<synchronous>, transform_indices = @transform_7, window_bounds = array<i64: 2, 1, 1>}, {pipeline_mode = #tpu.pipeline_mode<synchronous>, transform_indices = @transform_8, window_bounds = array<i64: 2, 1, 1>}, {pipeline_mode = #tpu.pipeline_mode<synchronous>, transform_indices = @transform_9, window_bounds = array<i64: 2, 1, 1>}, {pipeline_mode = #tpu.pipeline_mode<synchronous>, transform_indices = @transform_10, window_bounds = array<i64: 2, 1, 1>}]} {
    %c0_i32 = arith.constant 0 : i32
    %0 = arith.cmpi eq, %arg0, %c0_i32 : i32
    %1 = arith.extui %0 : i1 to i32
    %c0_i32_0 = arith.constant 0 : i32
    %2 = arith.cmpi ne, %1, %c0_i32_0 : i32
    scf.if %2 {
      %cst_62 = arith.constant 0.000000e+00 : f32
      %66 = vector.broadcast %cst_62 : f32 to vector<2x1x1xf32>
      %c0_63 = arith.constant 0 : index
      %c0_64 = arith.constant 0 : index
      %c0_65 = arith.constant 0 : index
      %67 = vector.load %arg7[%c0_63, %c0_64, %c0_65] : memref<2x1x1xf32, #tpu.memory_space<vmem>>, vector<2x1x1xf32>
      tpu.vector_store %arg7[%c0_63, %c0_64, %c0_65], %66 {strides = array<i32>} : memref<2x1x1xf32, #tpu.memory_space<vmem>>, vector<2x1x1xf32>,
      %cst_66 = arith.constant 0.000000e+00 : f32
      %68 = vector.broadcast %cst_66 : f32 to vector<2x1x1xf32>
      %c0_67 = arith.constant 0 : index
      %c0_68 = arith.constant 0 : index
      %c0_69 = arith.constant 0 : index
      %69 = vector.load %arg8[%c0_67, %c0_68, %c0_69] : memref<2x1x1xf32, #tpu.memory_space<vmem>>, vector<2x1x1xf32>
      tpu.vector_store %arg8[%c0_67, %c0_68, %c0_69], %68 {strides = array<i32>} : memref<2x1x1xf32, #tpu.memory_space<vmem>>, vector<2x1x1xf32>,
      %cst_70 = arith.constant 0.000000e+00 : f32
      %70 = vector.broadcast %cst_70 : f32 to vector<2x1x1xf32>
      %c0_71 = arith.constant 0 : index
      %c0_72 = arith.constant 0 : index
      %c0_73 = arith.constant 0 : index
      %71 = vector.load %arg9[%c0_71, %c0_72, %c0_73] : memref<2x1x1xf32, #tpu.memory_space<vmem>>, vector<2x1x1xf32>
      tpu.vector_store %arg9[%c0_71, %c0_72, %c0_73], %70 {strides = array<i32>} : memref<2x1x1xf32, #tpu.memory_space<vmem>>, vector<2x1x1xf32>,
      %cst_74 = arith.constant 0.000000e+00 : f32
      %72 = vector.broadcast %cst_74 : f32 to vector<2x1x1xf32>
      %c0_75 = arith.constant 0 : index
      %c0_76 = arith.constant 0 : index
      %c0_77 = arith.constant 0 : index
      %73 = vector.load %arg10[%c0_75, %c0_76, %c0_77] : memref<2x1x1xf32, #tpu.memory_space<vmem>>, vector<2x1x1xf32>
      tpu.vector_store %arg10[%c0_75, %c0_76, %c0_77], %72 {strides = array<i32>} : memref<2x1x1xf32, #tpu.memory_space<vmem>>, vector<2x1x1xf32>,
      %cst_78 = arith.constant 0.000000e+00 : f32
      %74 = vector.broadcast %cst_78 : f32 to vector<2x1x1xf32>
      %c0_79 = arith.constant 0 : index
      %c0_80 = arith.constant 0 : index
      %c0_81 = arith.constant 0 : index
      %75 = vector.load %arg11[%c0_79, %c0_80, %c0_81] : memref<2x1x1xf32, #tpu.memory_space<vmem>>, vector<2x1x1xf32>
      tpu.vector_store %arg11[%c0_79, %c0_80, %c0_81], %74 {strides = array<i32>} : memref<2x1x1xf32, #tpu.memory_space<vmem>>, vector<2x1x1xf32>,
    } else {
    }
    %c0 = arith.constant 0 : index
    %c0_1 = arith.constant 0 : index
    %c0_2 = arith.constant 0 : index
    %3 = vector.load %arg1[%c0, %c0_1, %c0_2] : memref<2x8x128xf32, #tpu.memory_space<vmem>>, vector<2x8x128xf32>
    %4 = arith.negf %3 : vector<2x8x128xf32>
    %5 = math.exp %4 : vector<2x8x128xf32>
    %cst = arith.constant 1.000000e+00 : f32
    %6 = vector.broadcast %cst : f32 to vector<2x8x128xf32>
    %7 = arith.addf %6, %5 : vector<2x8x128xf32>
    %8 = arith.divf %6, %7 : vector<2x8x128xf32>
    %c0_3 = arith.constant 0 : index
    %c0_4 = arith.constant 0 : index
    %c0_5 = arith.constant 0 : index
    %9 = vector.load %arg3[%c0_3, %c0_4, %c0_5] : memref<2x8x128xf32, #tpu.memory_space<vmem>>, vector<2x8x128xf32>
    %c0_6 = arith.constant 0 : index
    %c0_7 = arith.constant 0 : index
    %c0_8 = arith.constant 0 : index
    %10 = vector.load %arg2[%c0_6, %c0_7, %c0_8] : memref<2x8x128xf32, #tpu.memory_space<vmem>>, vector<2x8x128xf32>
    %cst_9 = arith.constant 5.000000e-01 : f32
    %11 = vector.broadcast %cst_9 : f32 to vector<2x8x128xf32>
    %12 = arith.cmpf ogt, %10, %11 : vector<2x8x128xf32>
    %cst_10 = arith.constant 1.000000e+00 : f32
    %cst_11 = arith.constant 0.000000e+00 : f32
    %13 = vector.broadcast %cst_10 : f32 to vector<2x8x128xf32>
    %14 = vector.broadcast %cst_11 : f32 to vector<2x8x128xf32>
    %15 = arith.select %12, %13, %14 : vector<2x8x128xi1>, vector<2x8x128xf32>
    %16 = arith.mulf %8, %9 : vector<2x8x128xf32>
    %17 = arith.mulf %15, %9 : vector<2x8x128xf32>
    %c0_12 = arith.constant 0 : index
    %c0_13 = arith.constant 0 : index
    %c0_14 = arith.constant 0 : index
    %18 = vector.load %arg7[%c0_12, %c0_13, %c0_14] : memref<2x1x1xf32, #tpu.memory_space<vmem>>, vector<2x1x1xf32>
    %19 = arith.mulf %16, %17 : vector<2x8x128xf32>
    %cst_15 = arith.constant dense<0.000000e+00> : vector<2x128xf32>
    %20 = vector.multi_reduction <add>, %19, %cst_15 [1] : vector<2x8x128xf32> to vector<2x128xf32>
    %21 = vector.shape_cast %20 : vector<2x128xf32> to vector<2x1x128xf32>
    %cst_16 = arith.constant dense<0.000000e+00> : vector<2x1xf32>
    %22 = vector.multi_reduction <add>, %21, %cst_16 [2] : vector<2x1x128xf32> to vector<2x1xf32>
    %23 = vector.shape_cast %22 : vector<2x1xf32> to vector<2x1x1xf32>
    %24 = arith.addf %18, %23 : vector<2x1x1xf32>
    %c0_17 = arith.constant 0 : index
    %c0_18 = arith.constant 0 : index
    %c0_19 = arith.constant 0 : index
    %25 = vector.load %arg7[%c0_17, %c0_18, %c0_19] : memref<2x1x1xf32, #tpu.memory_space<vmem>>, vector<2x1x1xf32>
    tpu.vector_store %arg7[%c0_17, %c0_18, %c0_19], %24 {strides = array<i32>} : memref<2x1x1xf32, #tpu.memory_space<vmem>>, vector<2x1x1xf32>,
    %c0_20 = arith.constant 0 : index
    %c0_21 = arith.constant 0 : index
    %c0_22 = arith.constant 0 : index
    %26 = vector.load %arg8[%c0_20, %c0_21, %c0_22] : memref<2x1x1xf32, #tpu.memory_space<vmem>>, vector<2x1x1xf32>
    %27 = arith.mulf %16, %16 : vector<2x8x128xf32>
    %cst_23 = arith.constant dense<0.000000e+00> : vector<2x128xf32>
    %28 = vector.multi_reduction <add>, %27, %cst_23 [1] : vector<2x8x128xf32> to vector<2x128xf32>
    %29 = vector.shape_cast %28 : vector<2x128xf32> to vector<2x1x128xf32>
    %cst_24 = arith.constant dense<0.000000e+00> : vector<2x1xf32>
    %30 = vector.multi_reduction <add>, %29, %cst_24 [2] : vector<2x1x128xf32> to vector<2x1xf32>
    %31 = vector.shape_cast %30 : vector<2x1xf32> to vector<2x1x1xf32>
    %32 = arith.addf %26, %31 : vector<2x1x1xf32>
    %c0_25 = arith.constant 0 : index
    %c0_26 = arith.constant 0 : index
    %c0_27 = arith.constant 0 : index
    %33 = vector.load %arg8[%c0_25, %c0_26, %c0_27] : memref<2x1x1xf32, #tpu.memory_space<vmem>>, vector<2x1x1xf32>
    tpu.vector_store %arg8[%c0_25, %c0_26, %c0_27], %32 {strides = array<i32>} : memref<2x1x1xf32, #tpu.memory_space<vmem>>, vector<2x1x1xf32>,
    %c0_28 = arith.constant 0 : index
    %c0_29 = arith.constant 0 : index
    %c0_30 = arith.constant 0 : index
    %34 = vector.load %arg9[%c0_28, %c0_29, %c0_30] : memref<2x1x1xf32, #tpu.memory_space<vmem>>, vector<2x1x1xf32>
    %35 = arith.mulf %17, %17 : vector<2x8x128xf32>
    %cst_31 = arith.constant dense<0.000000e+00> : vector<2x128xf32>
    %36 = vector.multi_reduction <add>, %35, %cst_31 [1] : vector<2x8x128xf32> to vector<2x128xf32>
    %37 = vector.shape_cast %36 : vector<2x128xf32> to vector<2x1x128xf32>
    %cst_32 = arith.constant dense<0.000000e+00> : vector<2x1xf32>
    %38 = vector.multi_reduction <add>, %37, %cst_32 [2] : vector<2x1x128xf32> to vector<2x1xf32>
    %39 = vector.shape_cast %38 : vector<2x1xf32> to vector<2x1x1xf32>
    %40 = arith.addf %34, %39 : vector<2x1x1xf32>
    %c0_33 = arith.constant 0 : index
    %c0_34 = arith.constant 0 : index
    %c0_35 = arith.constant 0 : index
    %41 = vector.load %arg9[%c0_33, %c0_34, %c0_35] : memref<2x1x1xf32, #tpu.memory_space<vmem>>, vector<2x1x1xf32>
    tpu.vector_store %arg9[%c0_33, %c0_34, %c0_35], %40 {strides = array<i32>} : memref<2x1x1xf32, #tpu.memory_space<vmem>>, vector<2x1x1xf32>,
    %c0_36 = arith.constant 0 : index
    %c0_37 = arith.constant 0 : index
    %c0_38 = arith.constant 0 : index
    %42 = vector.load %arg4[%c0_36, %c0_37, %c0_38] : memref<2x8x128xf32, #tpu.memory_space<vmem>>, vector<2x8x128xf32>
    %43 = arith.negf %42 : vector<2x8x128xf32>
    %44 = math.exp %43 : vector<2x8x128xf32>
    %cst_39 = arith.constant 1.000000e+00 : f32
    %45 = vector.broadcast %cst_39 : f32 to vector<2x8x128xf32>
    %46 = arith.addf %45, %44 : vector<2x8x128xf32>
    %47 = arith.divf %45, %46 : vector<2x8x128xf32>
    %c0_40 = arith.constant 0 : index
    %c0_41 = arith.constant 0 : index
    %c0_42 = arith.constant 0 : index
    %48 = vector.load %arg10[%c0_40, %c0_41, %c0_42] : memref<2x1x1xf32, #tpu.memory_space<vmem>>, vector<2x1x1xf32>
    %c0_43 = arith.constant 0 : index
    %c0_44 = arith.constant 0 : index
    %c0_45 = arith.constant 0 : index
    %49 = vector.load %arg5[%c0_43, %c0_44, %c0_45] : memref<2x8x128xf32, #tpu.memory_space<vmem>>, vector<2x8x128xf32>
    %50 = arith.subf %49, %47 : vector<2x8x128xf32>
    %51 = math.absf %50 : vector<2x8x128xf32>
    %cst_46 = arith.constant dense<0.000000e+00> : vector<2x128xf32>
    %52 = vector.multi_reduction <add>, %51, %cst_46 [1] : vector<2x8x128xf32> to vector<2x128xf32>
    %53 = vector.shape_cast %52 : vector<2x128xf32> to vector<2x1x128xf32>
    %cst_47 = arith.constant dense<0.000000e+00> : vector<2x1xf32>
    %54 = vector.multi_reduction <add>, %53, %cst_47 [2] : vector<2x1x128xf32> to vector<2x1xf32>
    %55 = vector.shape_cast %54 : vector<2x1xf32> to vector<2x1x1xf32>
    %56 = arith.addf %48, %55 : vector<2x1x1xf32>
    %c0_48 = arith.constant 0 : index
    %c0_49 = arith.constant 0 : index
    %c0_50 = arith.constant 0 : index
    %57 = vector.load %arg10[%c0_48, %c0_49, %c0_50] : memref<2x1x1xf32, #tpu.memory_space<vmem>>, vector<2x1x1xf32>
    tpu.vector_store %arg10[%c0_48, %c0_49, %c0_50], %56 {strides = array<i32>} : memref<2x1x1xf32, #tpu.memory_space<vmem>>, vector<2x1x1xf32>,
    %c0_51 = arith.constant 0 : index
    %c0_52 = arith.constant 0 : index
    %c0_53 = arith.constant 0 : index
    %58 = vector.load %arg11[%c0_51, %c0_52, %c0_53] : memref<2x1x1xf32, #tpu.memory_space<vmem>>, vector<2x1x1xf32>
    %c0_54 = arith.constant 0 : index
    %c0_55 = arith.constant 0 : index
    %c0_56 = arith.constant 0 : index
    %59 = vector.load %arg6[%c0_54, %c0_55, %c0_56] : memref<2x8x128xf32, #tpu.memory_space<vmem>>, vector<2x8x128xf32>
    %cst_57 = arith.constant dense<0.000000e+00> : vector<2x128xf32>
    %60 = vector.multi_reduction <add>, %59, %cst_57 [1] : vector<2x8x128xf32> to vector<2x128xf32>
    %61 = vector.shape_cast %60 : vector<2x128xf32> to vector<2x1x128xf32>
    %cst_58 = arith.constant dense<0.000000e+00> : vector<2x1xf32>
    %62 = vector.multi_reduction <add>, %61, %cst_58 [2] : vector<2x1x128xf32> to vector<2x1xf32>
    %63 = vector.shape_cast %62 : vector<2x1xf32> to vector<2x1x1xf32>
    %64 = arith.addf %58, %63 : vector<2x1x1xf32>
    %c0_59 = arith.constant 0 : index
    %c0_60 = arith.constant 0 : index
    %c0_61 = arith.constant 0 : index
    %65 = vector.load %arg11[%c0_59, %c0_60, %c0_61] : memref<2x1x1xf32, #tpu.memory_space<vmem>>, vector<2x1x1xf32>
    tpu.vector_store %arg11[%c0_59, %c0_60, %c0_61], %64 {strides = array<i32>} : memref<2x1x1xf32, #tpu.memory_space<vmem>>, vector<2x1x1xf32>,
    return
  }
  func.func @transform_0(%arg0: i32) -> (i32, i32, i32) {
    %c0_i32 = arith.constant 0 : i32
    %c0_i32_0 = arith.constant 0 : i32
    %c0_i32_1 = arith.constant 0 : i32
    return %c0_i32, %arg0, %c0_i32_0 : i32, i32, i32
  }
  func.func @transform_1(%arg0: i32) -> (i32, i32, i32) {
    %c0_i32 = arith.constant 0 : i32
    %c0_i32_0 = arith.constant 0 : i32
    %c0_i32_1 = arith.constant 0 : i32
    return %c0_i32, %arg0, %c0_i32_0 : i32, i32, i32
  }
  func.func @transform_2(%arg0: i32) -> (i32, i32, i32) {
    %c0_i32 = arith.constant 0 : i32
    %c0_i32_0 = arith.constant 0 : i32
    %c0_i32_1 = arith.constant 0 : i32
    return %c0_i32, %arg0, %c0_i32_0 : i32, i32, i32
  }
  func.func @transform_3(%arg0: i32) -> (i32, i32, i32) {
    %c0_i32 = arith.constant 0 : i32
    %c0_i32_0 = arith.constant 0 : i32
    %c0_i32_1 = arith.constant 0 : i32
    return %c0_i32, %arg0, %c0_i32_0 : i32, i32, i32
  }
  func.func @transform_4(%arg0: i32) -> (i32, i32, i32) {
    %c0_i32 = arith.constant 0 : i32
    %c0_i32_0 = arith.constant 0 : i32
    %c0_i32_1 = arith.constant 0 : i32
    return %c0_i32, %arg0, %c0_i32_0 : i32, i32, i32
  }
  func.func @transform_5(%arg0: i32) -> (i32, i32, i32) {
    %c0_i32 = arith.constant 0 : i32
    %c0_i32_0 = arith.constant 0 : i32
    %c0_i32_1 = arith.constant 0 : i32
    return %c0_i32, %arg0, %c0_i32_0 : i32, i32, i32
  }
  func.func @transform_6(%arg0: i32) -> (i32, i32, i32) {
    %c0_i32 = arith.constant 0 : i32
    %c0_i32_0 = arith.constant 0 : i32
    %c0_i32_1 = arith.constant 0 : i32
    %c0_i32_2 = arith.constant 0 : i32
    return %c0_i32, %c0_i32_0, %c0_i32_1 : i32, i32, i32
  }
  func.func @transform_7(%arg0: i32) -> (i32, i32, i32) {
    %c0_i32 = arith.constant 0 : i32
    %c0_i32_0 = arith.constant 0 : i32
    %c0_i32_1 = arith.constant 0 : i32
    %c0_i32_2 = arith.constant 0 : i32
    return %c0_i32, %c0_i32_0, %c0_i32_1 : i32, i32, i32
  }
  func.func @transform_8(%arg0: i32) -> (i32, i32, i32) {
    %c0_i32 = arith.constant 0 : i32
    %c0_i32_0 = arith.constant 0 : i32
    %c0_i32_1 = arith.constant 0 : i32
    %c0_i32_2 = arith.constant 0 : i32
    return %c0_i32, %c0_i32_0, %c0_i32_1 : i32, i32, i32
  }
  func.func @transform_9(%arg0: i32) -> (i32, i32, i32) {
    %c0_i32 = arith.constant 0 : i32
    %c0_i32_0 = arith.constant 0 : i32
    %c0_i32_1 = arith.constant 0 : i32
    %c0_i32_2 = arith.constant 0 : i32
    return %c0_i32, %c0_i32_0, %c0_i32_1 : i32, i32, i32
  }
  func.func @transform_10(%arg0: i32) -> (i32, i32, i32) {
    %c0_i32 = arith.constant 0 : i32
    %c0_i32_0 = arith.constant 0 : i32
    %c0_i32_1 = arith.constant 0 : i32
    %c0_i32_2 = arith.constant 0 : i32
    return %c0_i32, %c0_i32_0, %c0_i32_1 : i32, i32, i32
  }
}

</mosaic_0001>

<bundles_post_ra>
// kernel: squeeze.2
= control target key start
LH: loop header
LB: loop body
LE: loop exit
PB: predicated region body
PF: predicated region fallthrough
CT: control target
= control target key end

     0   :  { %s8_s6 = smov 3  ;;  %s11_s7 = smov 12  ;;  %vm13_vm0 = vcmask 1043458   ;;  %vm3_vm1 = vcmask 130048   ;;  %vm17_vm2 = vcmask 1048448   ;;  %vm31_vm3 = vcmask 917248   ;;  %s213_s0 = inlined_call_operand.vmem [shape: f32[2,1,16,16], index: 0, kind: input, shape index: {}]   ;;  %s214_s1 = inlined_call_operand.vmem [shape: f32[2,256], index: 1, kind: output, shape index: {}]  }
   0x1   :  { %v116_v0 = vld [vmem:[%s213_s0 + $0x7] ss:$16 sm:%s8_s6]   ;;  %v117_v1 = vld [vmem:[%s213_s0 - $0x11] ss:$16 sm:%s11_s7]   ;;  %s36_s12 = smov 3  ;;  %s39_s15 = smov 12 }
   0x2   :  { %v14_v2 = vsel %vm13_vm0, %v117_v1, %v116_v0  ;;  %v120_v3 = vld [vmem:[%s213_s0 + $0x5] ss:$16 sm:%s36_s12]   ;;  %s138_s16 = smov 112   ;;  %v121_v4 = vld [vmem:[%s213_s0 - $0x13] ss:$16 sm:%s39_s15]   ;;  %s22_s19 = smov 3 }
   0x3   :  { %15 = vrot.lane.b32.xlu0 %v14_v2, %s138_s16  ;;  %s25_s20 = smov 12  ;;  %v42_v5 = vsel %vm13_vm0, %v121_v4, %v120_v3  ;;  %v118_v6 = vld [vmem:[%s213_s0 + $0x6] ss:$16 sm:%s22_s19]   ;;  %s50_s25 = smov 3  ;;  %vm45_vm4 = vcmask 786048   ;;  %vm59_vm5 = vcmask 654848  }
   0x4   :  { %v119_v7 = vld [vmem:[%s213_s0 - $0x12] ss:$16 sm:%s25_s20]   ;;  %s139_s26 = smov 80   ;;  %v122_v9 = vld [vmem:[%s213_s0 + $0x4] ss:$16 sm:%s50_s25]   ;;  %s53_s29 = smov 12 }
   0x5   :  { %43 = vrot.lane.b32.xlu1 %v42_v5, %s139_s26  ;;  %v28_v8 = vsel %vm13_vm0, %v119_v7, %v118_v6  ;;  %v123_v10 = vld [vmem:[%s213_s0 - $0x14] ss:$16 sm:%s53_s29]   ;;  %s64_s3 = smov 3  ;;  %s67_s4 = smov 12  ;;  %vm73_vm6 = vcmask 523648   ;;  %vm87_vm7 = vcmask 392448  }
   0x6   :  { %s140_s5 = smov 96   ;;  %v56_v11 = vsel %vm13_vm0, %v123_v10, %v122_v9  ;;  %v124_v12 = vld [vmem:[%s213_s0 + $0x3] ss:$16 sm:%s64_s3]   ;;  %s78_s8 = smov 3  ;;  %v125_v13 = vld [vmem:[%s213_s0 - $0x15] ss:$16 sm:%s67_s4]  }
   0x7   :  { %29 = vrot.lane.b32.xlu0 %v28_v8, %s140_s5  ;;  %v126_v14 = vld [vmem:[%s213_s0 + $0x2] ss:$16 sm:%s78_s8]   ;;  %s81_s13 = smov 12  ;;  %s141_s14 = smov 64   ;;  %v70_v15 = vsel %vm13_vm0, %v125_v13, %v124_v12  ;;  %vm101_vm8 = vcmask 261248  }
   0x8   :  { %v127_v16 = vld [vmem:[%s213_s0 - $0x16] ss:$16 sm:%s81_s13]   ;;  %s92_s17 = smov 3  ;;  %s95_s18 = smov 12 }
   0x9   :  { %57 = vrot.lane.b32.xlu1 %v56_v11, %s141_s14  ;;  %v84_v17 = vsel %vm13_vm0, %v127_v16, %v126_v14  ;;  %v128_v18 = vld [vmem:[%s213_s0 + $0x1] ss:$16 sm:%s92_s17]   ;;  %s142_s23 = smov 48   ;;  %v2_v20 = vld [vmem:[%s213_s0] ss:$8 sm:$0xf]  }
   0xa   :  { %v129_v19 = vld [vmem:[%s213_s0 - $0x17] ss:$16 sm:%s95_s18]   ;;  %4 = vst.msk [vmem:[#allocation0] ss:$8 sm:$0x3] %vm3_vm1, %v2_v20   ;;  %s143_s0 = smov 32  }
   0xb   :  { %71 = vrot.lane.b32.xlu0 %v70_v15, %s142_s23  ;;  %v98_v21 = vsel %vm13_vm0, %v129_v19, %v128_v18  ;;  %6 = vst.msk [vmem:[#allocation0 - $0xf] ss:$8 sm:$0xc] %vm3_vm1, %v2_v20   ;;  %s144_s26 = smov 16  }
   0xd   :  { %85 = vrot.lane.b32.xlu1 %v84_v17, %s143_s0 }
   0xf   :  { %99 = vrot.lane.b32.xlu0 %v98_v21, %s144_s26 }
  0x75   :  { %v16_v22 = vpop.permute.xlu0 %15  }
  0x76   :  { %18 = vst.msk [vmem:[#allocation0] sm:$0x3] %vm17_vm2, %v16_v22   ;;  %20 = vst.msk [vmem:[#allocation0 + $0x6] sm:$0xc] %vm17_vm2, %v16_v22  }
  0x77   :  { %v44_v23 = vpop.permute.xlu1 %43  }
  0x79   :  { %v30_v24 = vpop.permute.xlu0 %29  }
  0x7a   :  { %32 = vst.msk [vmem:[#allocation0] sm:$0x3] %vm31_vm3, %v30_v24   ;;  %34 = vst.msk [vmem:[#allocation0 + $0x6] sm:$0xc] %vm31_vm3, %v30_v24  }
  0x7b   :  { %46 = vst.msk [vmem:[#allocation0] sm:$0x3] %vm45_vm4, %v44_v23   ;;  %48 = vst.msk [vmem:[#allocation0 + $0x6] sm:$0xc] %vm45_vm4, %v44_v23   ;;  %v58_v25 = vpop.permute.xlu1 %57  }
  0x7c   :  { %60 = vst.msk [vmem:[#allocation0] sm:$0x3] %vm59_vm5, %v58_v25   ;;  %62 = vst.msk [vmem:[#allocation0 + $0x6] sm:$0xc] %vm59_vm5, %v58_v25  }
  0x7d   :  { %v72_v26 = vpop.permute.xlu0 %71  }
  0x7e   :  { %74 = vst.msk [vmem:[#allocation0] sm:$0x3] %vm73_vm6, %v72_v26   ;;  %76 = vst.msk [vmem:[#allocation0 + $0x6] sm:$0xc] %vm73_vm6, %v72_v26  }
  0x7f   :  { %v86_v27 = vpop.permute.xlu1 %85  }
  0x80   :  { %88 = vst.msk [vmem:[#allocation0] sm:$0x3] %vm87_vm7, %v86_v27   ;;  %90 = vst.msk [vmem:[#allocation0 + $0x6] sm:$0xc] %vm87_vm7, %v86_v27  }
  0x81   :  { %v100_v28 = vpop.permute.xlu0 %99  }
  0x82   :  { %102 = vst.msk [vmem:[#allocation0] sm:$0x3] %vm101_vm8, %v100_v28   ;;  %104 = vst.msk [vmem:[#allocation0 + $0x6] sm:$0xc] %vm101_vm8, %v100_v28  }
  0x89   :  { %v108_v29 = vld [vmem:[#allocation0] sm:$0x3]  ;;  %v112_v30 = vld [vmem:[#allocation0 + $0x8] sm:$0x3] }
  0x8a   :  { %110 = vst [vmem:[%s214_s1] sm:$0x3] %v108_v29  ;;  %130 = vst [vmem:[%s214_s1 + $0x2] sm:$0x3] %v112_v30 }

// kernel: neg.3
= control target key start
LH: loop header
LB: loop body
LE: loop exit
PB: predicated region body
PF: predicated region fallthrough
CT: control target
= control target key end

     0   :  { %s40_s0 = inlined_call_operand.vmem [shape: f32[2,256], index: 0, kind: input, shape index: {}]   ;;  %s41_s1 = inlined_call_operand.vmem [shape: f32[2,256], index: 1, kind: output, shape index: {}]  }
   0x1   :  { %v2_v0 = vld [vmem:[%s40_s0] sm:$0x3]  ;;  %v16_v1 = vld [vmem:[%s40_s0 + $0x2] sm:$0x3] }
   0x2   :  { %v5_v2 = vxor.u32 2147483648, %v2_v0  ;;  %v12_v3 = vxor.u32 2147483648, %v16_v1 }
   0x4   :  { %7 = vst [vmem:[%s41_s1] sm:$0x3] %v5_v2  ;;  %17 = vst [vmem:[%s41_s1 + $0x2] sm:$0x3] %v12_v3 }

// kernel: pan_loss.1
= control target key start
LH: loop header
LB: loop body
LE: loop exit
PB: predicated region body
PF: predicated region fallthrough
CT: control target
= control target key end

     0   :  { %16 = vsyncpa [#allocation3], 0  ;;  %s969_s0 = inlined_call_operand.hbm [shape: f32[2,8,128], index: 0, kind: input, shape index: {}]   ;;  %s970_s1 = inlined_call_operand.hbm [shape: f32[2,8,128], index: 1, kind: input, shape index: {}]   ;;  %s971_s2 = inlined_call_operand.hbm [shape: f32[2,8,128], index: 2, kind: input, shape index: {}]   ;;  %s972_s3 = inlined_call_operand.hbm [shape: f32[2,8,128], index: 3, kind: input, shape index: {}]   ;;  %s973_s4 = inlined_call_operand.hbm [shape: f32[2,8,128], index: 4, kind: input, shape index: {}]   ;;  %s974_s5 = inlined_call_operand.hbm [shape: f32[2,8,128], index: 5, kind: input, shape index: {}]   ;;  %s975_s6 = inlined_call_operand.hbm [shape: f32[2,1,1], index: 6, kind: output, shape index: {0}]   ;;  %s976_s7 = inlined_call_operand.hbm [shape: f32[2,1,1], index: 7, kind: output, shape index: {1}]   ;;  %s977_s8 = inlined_call_operand.hbm [shape: f32[2,1,1], index: 8, kind: output, shape index: {2}]   ;;  %s978_s9 = inlined_call_operand.hbm [shape: f32[2,1,1], index: 9, kind: output, shape index: {3}]   ;;  %s979_s10 = inlined_call_operand.hbm [shape: f32[2,1,1], index: 10, kind: output, shape index: {4}]  }
   0x1   :  { %17 = vsyncpa [#allocation6], 0 }
   0x2   :  { %18 = vsyncpa [#allocation9], 0 }
   0x3   :  { %19 = vsyncpa [#allocation12], 0 }
   0x4   :  { %20 = vsyncpa [#allocation4], 0 }
   0x5   :  { %21 = vsyncpa [#allocation15], 0 }
   0x6   :  { %22 = vsyncpa [#allocation18], 0  ;;  %s667_s13 = smov [#allocation5]   ;;  %s668_s15 = smov [#allocation8]  }
   0x7   :  { %s40_s14 = sshll.u32 %s667_s13, 4  ;;  %s64_s16 = sshll.u32 %s668_s15, 4  ;;  %s41_s14 = int_to_ptr.vmem [resolvable:$true] %s40_s14  ;;  %s738_s16 = int_to_ptr.vmem [resolvable:$true] %s64_s16 }
   0x8   :  { %s411_s19 = scalar_lea.hbm %s970_s1, 256 }
   0x9   :  { %p412_p0 = scmp.ne.s32.totalorder %s970_s1, %s411_s19  ;;  %p415_p1 = scmp.lt.u32.totalorder %s411_s19, %s970_s1 }
   0xb   :  { %p417_p2 = pnand %p415_p1, %p412_p0 }
   0xd   :  { %420 = shalt.err (!%p417_p2)
}
   0xe   :  { %s421_s24 = scalar_lea.vmem %s41_s14, 256  ;;  %p426_p4 = scmp.lt.s32.totalorder %s41_s14, %s41_s14 }
   0xf   :  { %p422_p3 = scmp.ne.s32.totalorder %s41_s14, %s421_s24  ;;  %p427_p5 = scmp.lt.s32.totalorder %s421_s24, %s421_s24 }
  0x11   :  { %p428_p6 = por %p427_p5, %p426_p4 }
  0x13   :  { %p429_p7 = pnand %p428_p6, %p422_p3 }
  0x15   :  { %432 = shalt.err (!%p429_p7)
}
  0x16   :  { %s669_s25 = smov 128   ;;  %s670_s26 = smov 8  }
  0x17   :  { %46 = dma.hbm_to_vmem [thread:$0]  %s970_s1, 256, %s41_s14, [#allocation6], %s669_s25, %s669_s25, %s670_s26  }
  0x18   :  { %s433_s11 = scalar_lea.hbm %s972_s3, 256 }
  0x19   :  { %p434_p8 = scmp.ne.s32.totalorder %s972_s3, %s433_s11  ;;  %p437_p9 = scmp.lt.u32.totalorder %s433_s11, %s972_s3 }
  0x1b   :  { %p439_p10 = pnand %p437_p9, %p434_p8 }
  0x1d   :  { %442 = shalt.err (!%p439_p10)
}
  0x1e   :  { %s443_s18 = scalar_lea.vmem %s738_s16, 256  ;;  %p448_p12 = scmp.lt.s32.totalorder %s738_s16, %s738_s16 }
  0x1f   :  { %p444_p11 = scmp.ne.s32.totalorder %s738_s16, %s443_s18  ;;  %p449_p13 = scmp.lt.s32.totalorder %s443_s18, %s443_s18 }
  0x21   :  { %p450_p0 = por %p449_p13, %p448_p12 }
  0x23   :  { %p451_p1 = pnand %p450_p0, %p444_p11 }
  0x25   :  { %454 = shalt.err (!%p451_p1)
}
  0x26   :  { %70 = dma.hbm_to_vmem [thread:$0]  %s972_s3, 256, %s738_s16, [#allocation9], %s669_s25, %s669_s25, %s670_s26  }
  0x27   :  { %s671_s19 = smov [#allocation2]   ;;  %s672_s21 = smov [#allocation7]  }
  0x28   :  { %s28_s20 = sshll.u32 %s671_s19, 4  ;;  %s52_s22 = sshll.u32 %s672_s21, 4  ;;  %s29_s20 = int_to_ptr.vmem [resolvable:$true] %s28_s20  ;;  %s775_s22 = int_to_ptr.vmem [resolvable:$true] %s52_s22 }
  0x29   :  { %s455_s27 = scalar_lea.hbm %s969_s0, 256 }
  0x2a   :  { %p456_p2 = scmp.ne.s32.totalorder %s969_s0, %s455_s27  ;;  %p459_p3 = scmp.lt.u32.totalorder %s455_s27, %s969_s0 }
  0x2c   :  { %p461_p4 = pnand %p459_p3, %p456_p2 }
  0x2e   :  { %464 = shalt.err (!%p461_p4)
}
  0x2f   :  { %s465_s3 = scalar_lea.vmem %s29_s20, 256  ;;  %p470_p6 = scmp.lt.s32.totalorder %s29_s20, %s29_s20 }
  0x30   :  { %p466_p5 = scmp.ne.s32.totalorder %s29_s20, %s465_s3  ;;  %p471_p7 = scmp.lt.s32.totalorder %s465_s3, %s465_s3 }
  0x32   :  { %p472_p8 = por %p471_p7, %p470_p6 }
  0x34   :  { %p473_p9 = pnand %p472_p8, %p466_p5 }
  0x36   :  { %476 = shalt.err (!%p473_p9)
}
  0x37   :  { %34 = dma.hbm_to_vmem [thread:$0]  %s969_s0, 256, %s29_s20, [#allocation3], %s669_s25, %s669_s25, %s670_s26  }
  0x38   :  { %s477_s17 = scalar_lea.hbm %s971_s2, 256 }
  0x39   :  { %p478_p10 = scmp.ne.s32.totalorder %s971_s2, %s477_s17  ;;  %p481_p11 = scmp.lt.u32.totalorder %s477_s17, %s971_s2 }
  0x3b   :  { %p483_p12 = pnand %p481_p11, %p478_p10 }
  0x3d   :  { %486 = shalt.err (!%p483_p12)
}
  0x3e   :  { %s487_s21 = scalar_lea.vmem %s775_s22, 256  ;;  %p492_p0 = scmp.lt.s32.totalorder %s775_s22, %s775_s22 }
  0x3f   :  { %p488_p13 = scmp.ne.s32.totalorder %s775_s22, %s487_s21  ;;  %p493_p1 = scmp.lt.s32.totalorder %s487_s21, %s487_s21 }
  0x41   :  { %p494_p2 = por %p493_p1, %p492_p0 }
  0x43   :  { %p495_p3 = pnand %p494_p2, %p488_p13 }
  0x45   :  { %498 = shalt.err (!%p495_p3)
}
  0x46   :  { %58 = dma.hbm_to_vmem [thread:$0]  %s971_s2, 256, %s775_s22, [#allocation6], %s669_s25, %s669_s25, %s670_s26  }
  0x47   :  { %s673_s23 = smov [#allocation10]   ;;  %s674_s27 = smov [#allocation11]  }
  0x48   :  { %s76_s24 = sshll.u32 %s673_s23, 4  ;;  %s88_s28 = sshll.u32 %s674_s27, 4  ;;  %s77_s24 = int_to_ptr.vmem [resolvable:$true] %s76_s24  ;;  %s812_s28 = int_to_ptr.vmem [resolvable:$true] %s88_s28 }
  0x49   :  { %s499_s11 = scalar_lea.hbm %s973_s4, 256 }
  0x4a   :  { %p500_p4 = scmp.ne.s32.totalorder %s973_s4, %s499_s11  ;;  %p503_p5 = scmp.lt.u32.totalorder %s499_s11, %s973_s4 }
  0x4c   :  { %p505_p6 = pnand %p503_p5, %p500_p4 }
  0x4e   :  { %508 = shalt.err (!%p505_p6)
}
  0x4f   :  { %s509_s2 = scalar_lea.vmem %s77_s24, 256  ;;  %p514_p8 = scmp.lt.s32.totalorder %s77_s24, %s77_s24 }
  0x50   :  { %p510_p7 = scmp.ne.s32.totalorder %s77_s24, %s509_s2  ;;  %p515_p9 = scmp.lt.s32.totalorder %s509_s2, %s509_s2 }
  0x52   :  { %p516_p10 = por %p515_p9, %p514_p8 }
  0x54   :  { %p517_p11 = pnand %p516_p10, %p510_p7 }
  0x56   :  { %520 = shalt.err (!%p517_p11)
}
  0x57   :  { %82 = dma.hbm_to_vmem [thread:$0]  %s973_s4, 256, %s77_s24, [#allocation9], %s669_s25, %s669_s25, %s670_s26  }
  0x58   :  { %s521_s1 = scalar_lea.hbm %s974_s5, 256 }
  0x59   :  { %p522_p12 = scmp.ne.s32.totalorder %s974_s5, %s521_s1  ;;  %p525_p13 = scmp.lt.u32.totalorder %s521_s1, %s974_s5 }
  0x5b   :  { %p527_p0 = pnand %p525_p13, %p522_p12 }
  0x5d   :  { %530 = shalt.err (!%p527_p0)
}
  0x5e   :  { %s531_s20 = scalar_lea.vmem %s812_s28, 256  ;;  %p536_p2 = scmp.lt.s32.totalorder %s812_s28, %s812_s28 }
  0x5f   :  { %p532_p1 = scmp.ne.s32.totalorder %s812_s28, %s531_s20  ;;  %p537_p3 = scmp.lt.s32.totalorder %s531_s20, %s531_s20 }
  0x61   :  { %p538_p4 = por %p537_p3, %p536_p2 }
  0x63   :  { %p539_p5 = pnand %p538_p4, %p532_p1 }
  0x65   :  { %542 = shalt.err (!%p539_p5)
}
  0x66   :  { %94 = dma.hbm_to_vmem [thread:$0]  %s974_s5, 256, %s812_s28, [#allocation12], %s669_s25, %s669_s25, %s670_s26  }
  0x67   :  { %653 = dma.done.wait [#allocation3], 256  }
  0x68   :  { %654 = vsyncadd [#allocation3], 4294967040 }
  0x69   :  { %655 = dma.done.wait [#allocation6], 512  }
  0x6a   :  { %656 = vsyncadd [#allocation6], 4294966784 }
  0x6b   :  { %657 = dma.done.wait [#allocation9], 512  }
  0x6c   :  { %658 = vsyncadd [#allocation9], 4294966784 }
  0x6d   :  { %659 = dma.done.wait [#allocation12], 256  }
  0x6e   :  { %660 = vsyncadd [#allocation12], 4294967040  ;;  %vm117_vm0 = vcmask 0   ;;  %v675_v0 = vmov 0.0   ;;  %v859_v1 = vld [vmem:[#allocation7 + $0x8] sm:$0xff]  ;;  %v145_v2 = vld [vmem:[#allocation5 + $0x8] sm:$0xff] }
  0x6f   :  { %123 = vst.msk [vmem:[#allocation16 + $0x1] sm:$0x1] %vm117_vm0, %v675_v0  ;;  %118 = vst.msk [vmem:[#allocation13] sm:$0x1] %vm117_vm0, %v675_v0  ;;  %vm147_vm1 = vcmp.gt.f32.partialorder %v145_v2, 0.5  ;;  %v142_v3 = vld [vmem:[#allocation7] sm:$0xff] }
  0x70   :  { %119 = vst.msk [vmem:[#allocation13 + $0x1] sm:$0x1] %vm117_vm0, %v675_v0  ;;  %120 = vst.msk [vmem:[#allocation14] sm:$0x1] %vm117_vm0, %v675_v0  ;;  %v144_v4 = vld [vmem:[#allocation5] sm:$0xff]  ;;  %v149_v6 = vsel %vm147_vm1, 1.0, %v675_v0 }
  0x71   :  { %121 = vst.msk [vmem:[#allocation14 + $0x1] sm:$0x1] %vm117_vm0, %v675_v0  ;;  %122 = vst.msk [vmem:[#allocation16] sm:$0x1] %vm117_vm0, %v675_v0  ;;  %v227_v5 = vld [vmem:[#allocation8] sm:$0xff]  ;;  %vm146_vm2 = vcmp.gt.f32.partialorder %v144_v4, 0.5  ;;  %v153_v10 = vmul.f32 %v149_v6, %v859_v1 }
  0x72   :  { %124 = vst.msk [vmem:[#allocation17] sm:$0x1] %vm117_vm0, %v675_v0  ;;  %125 = vst.msk [vmem:[#allocation17 + $0x1] sm:$0x1] %vm117_vm0, %v675_v0  ;;  %v377_v7 = vmul.f32 -1.442695, %v227_v5 }
  0x73   :  { %126 = vst.msk [vmem:[#allocation19] sm:$0x1] %vm117_vm0, %v675_v0  ;;  %127 = vst.msk [vmem:[#allocation19 + $0x1] sm:$0x1] %vm117_vm0, %v675_v0  ;;  %v128_v8 = vld [vmem:[#allocation2] sm:$0xff]  ;;  %v228_v9 = vld [vmem:[#allocation8 + $0x8] sm:$0xff]  ;;  %v206_v16 = vmul.f32 %v153_v10, %v153_v10 }
  0x74   :  { %v148_v11 = vsel %vm146_vm2, 1.0, %v675_v0  ;;  %v375_v12 = vmul.f32 -1.442695, %v128_v8  ;;  %v378_v13 = vmul.f32 -1.442695, %v228_v9  ;;  %395 = vpow2.f32 %v377_v7  ;;  %v129_v15 = vld [vmem:[#allocation2 + $0x8] sm:$0xff] }
  0x75   :  { %v152_v14 = vmul.f32 %v148_v11, %v142_v3  ;;  %v376_v17 = vmul.f32 -1.442695, %v129_v15  ;;  %v213_v19 = vrot.slane %v206_v16, 4  ;;  %v243_v39 = vld [vmem:[#allocation10] sm:$0xff]  ;;  %v244_v41 = vld [vmem:[#allocation10 + $0x8] sm:$0xff]  ;;  %v272_v46 = vld [vmem:[#allocation11 + $0x8] sm:$0xff] }
  0x76   :  { %397 = vpow2.f32 %v375_v12  ;;  %v271_v47 = vld [vmem:[#allocation11] sm:$0xff]  ;;  %v279_v56 = vrot.slane %v272_v46, 4  ;;  %s676_s5 = smov [#allocation17]   ;;  %s677_s26 = smov [#allocation14]  }
  0x77   :  { %v205_v18 = vmul.f32 %v152_v14, %v152_v14  ;;  %399 = vpow2.f32 %v378_v13  ;;  %v214_v21 = vadd.f32 %v213_v19, %v206_v16  ;;  %v273_v57 = vrot.slane %v271_v47, 4  ;;  %s334_s25 = sshll.u32 %s676_s5, 4  ;;  %s310_s24 = sshll.u32 %s677_s26, 4  ;;  %s335_s25 = int_to_ptr.vmem [resolvable:$true] %s334_s25  ;;  %s867_s24 = int_to_ptr.vmem [resolvable:$true] %s310_s24 }
  0x78   :  { %401 = vpow2.f32 %v376_v17  ;;  %v280_v7 = vadd.f32 %v279_v56, %v272_v46  ;;  %s678_s27 = smov [#allocation13]   ;;  %s679_s29 = smov [#allocation16]  }
  0x79   :  { %v207_v20 = vrot.slane %v205_v18, 4  ;;  %v215_v23 = vrot.slane %v214_v21, 2  ;;  %v274_v8 = vadd.f32 %v273_v57, %v271_v47  ;;  %v241_v47 = vld [vmem:[#allocation17] sm:$0x1]  ;;  %s298_s28 = sshll.u32 %s678_s27, 4  ;;  %s322_s30 = sshll.u32 %s679_s29, 4  ;;  %s869_s28 = int_to_ptr.vmem [resolvable:$true] %s298_s28  ;;  %s872_s30 = int_to_ptr.vmem [resolvable:$true] %s322_s30 }
  0x7a   :  { %v281_v19 = vrot.slane %v280_v7, 2  ;;  %s543_s11 = scalar_lea.vmem %s335_s25, 32  ;;  %p548_p7 = scmp.lt.s32.totalorder %s335_s25, %s335_s25 }
  0x7b   :  { %v208_v22 = vadd.f32 %v207_v20, %v205_v18  ;;  %v216_v25 = vadd.f32 %v215_v23, %v214_v21  ;;  %v275_v20 = vrot.slane %v274_v8, 2  ;;  %p544_p6 = scmp.ne.s32.totalorder %s335_s25, %s543_s11  ;;  %p549_p8 = scmp.lt.s32.totalorder %s543_s11, %s543_s11 }
  0x7d   :  { %v209_v24 = vrot.slane %v208_v22, 2  ;;  %v217_v29 = vrot.slane %v216_v25, 1  ;;  %p550_p9 = por %p549_p8, %p548_p7 }
  0x7e   :  { %v396_v26 = vpop.eup %395 }
  0x7f   :  { %v210_v27 = vadd.f32 %v209_v24, %v208_v22  ;;  %v235_v30 = vadd.f32 1.0, %v396_v26  ;;  %v218_v35 = vadd.f32 %v217_v29, %v216_v25  ;;  %p551_p10 = pnand %p550_p9, %p544_p6 }
  0x80   :  { %v398_v28 = vpop.eup %397 }
  0x81   :  { %v400_v31 = vpop.eup %399  ;;  %v211_v32 = vrot.slane %v210_v27, 1  ;;  %v136_v33 = vadd.f32 1.0, %v398_v28  ;;  %403 = vrcp.f32 %v235_v30  ;;  %221 = vadd.xlane.f32.xlu1 %v218_v35 }
  0x82   :  { %v402_v34 = vpop.eup %401  ;;  %v236_v36 = vadd.f32 1.0, %v400_v31  ;;  %v282_v31 = vadd.f32 %v281_v19, %v280_v7 }
  0x83   :  { %v212_v37 = vadd.f32 %v211_v32, %v210_v27  ;;  %405 = vrcp.f32 %v136_v33  ;;  %v137_v38 = vadd.f32 1.0, %v402_v34  ;;  %v276_v34 = vadd.f32 %v275_v20, %v274_v8 }
  0x84   :  { %407 = vrcp.f32 %v236_v36  ;;  %v283_v36 = vrot.slane %v282_v31, 1 }
  0x85   :  { %219 = vadd.xlane.f32.xlu0 %v212_v37  ;;  %409 = vrcp.f32 %v137_v38  ;;  %v277_v38 = vrot.slane %v276_v34, 1 }
  0x8b   :  { %v404_v40 = vpop.eup %403 }
  0x8c   :  { %v245_v43 = vsub.f32 %v243_v39, %v404_v40  ;;  %v284_v39 = vadd.f32 %v283_v36, %v282_v31  ;;  %v278_v40 = vadd.f32 %v277_v38, %v276_v34 }
  0x8d   :  { %v406_v42 = vpop.eup %405 }
  0x8e   :  { %v408_v44 = vpop.eup %407  ;;  %v150_v45 = vmul.f32 %v406_v42, %v142_v3  ;;  %v247_v49 = vand.u32 2147483647, %v245_v43  ;;  %v203_v42 = vld [vmem:[#allocation16] sm:$0x1] }
  0x8f   :  { %v410_v48 = vpop.eup %409  ;;  %v246_v50 = vsub.f32 %v244_v41, %v408_v44  ;;  %v204_v41 = vld [vmem:[#allocation16 + $0x1] sm:$0x1] }
  0x90   :  { %v181_v51 = vmul.f32 %v150_v45, %v150_v45  ;;  %v151_v52 = vmul.f32 %v410_v48, %v859_v1  ;;  %v156_v53 = vmul.f32 %v152_v14, %v150_v45  ;;  %v249_v54 = vrot.slane %v247_v49, 4  ;;  %v179_v48 = vld [vmem:[#allocation14] sm:$0x1] }
  0x91   :  { %v248_v55 = vand.u32 2147483647, %v246_v50 }
  0x92   :  { %v183_v58 = vrot.slane %v181_v51, 4  ;;  %v182_v59 = vmul.f32 %v151_v52, %v151_v52  ;;  %v157_v60 = vmul.f32 %v153_v10, %v151_v52  ;;  %v158_v61 = vrot.slane %v156_v53, 4 }
  0x93   :  { %v250_v62 = vadd.f32 %v249_v54, %v247_v49  ;;  %v255_v63 = vrot.slane %v248_v55, 4  ;;  %v180_v54 = vld [vmem:[#allocation14 + $0x1] sm:$0x1] }
  0x94   :  { %v184_v0 = vadd.f32 %v183_v58, %v181_v51  ;;  %v189_v2 = vrot.slane %v182_v59, 4  ;;  %v164_v3 = vrot.slane %v157_v60, 4  ;;  %v159_v4 = vadd.f32 %v158_v61, %v156_v53  ;;  %v242_v53 = vld [vmem:[#allocation17 + $0x1] sm:$0x1] }
  0x95   :  { %v251_v5 = vrot.slane %v250_v62, 2  ;;  %v256_v6 = vadd.f32 %v255_v63, %v248_v55 }
  0x96   :  { %v185_v1 = vrot.slane %v184_v0, 2  ;;  %v190_v9 = vadd.f32 %v189_v2, %v182_v59  ;;  %v165_v11 = vadd.f32 %v164_v3, %v157_v60  ;;  %v160_v12 = vrot.slane %v159_v4, 2  ;;  %v155_v59 = vld [vmem:[#allocation13 + $0x1] sm:$0x1]  ;;  %v154_v60 = vld [vmem:[#allocation13] sm:$0x1] }
  0x97   :  { %v252_v13 = vadd.f32 %v251_v5, %v250_v62  ;;  %v257_v14 = vrot.slane %v256_v6, 2 }
  0x98   :  { %v186_v15 = vadd.f32 %v185_v1, %v184_v0  ;;  %v191_v16 = vrot.slane %v190_v9, 2  ;;  %v166_v10 = vrot.slane %v165_v11, 2  ;;  %v161_v24 = vadd.f32 %v160_v12, %v159_v4 }
  0x99   :  { %v253_v17 = vrot.slane %v252_v13, 1  ;;  %v258_v18 = vadd.f32 %v257_v14, %v256_v6 }
  0x9a   :  { %v187_v21 = vrot.slane %v186_v15, 1  ;;  %v192_v22 = vadd.f32 %v191_v16, %v190_v9  ;;  %v167_v23 = vadd.f32 %v166_v10, %v165_v11  ;;  %v162_v33 = vrot.slane %v161_v24, 1 }
  0x9b   :  { %v254_v25 = vadd.f32 %v253_v17, %v252_v13  ;;  %v259_v26 = vrot.slane %v258_v18, 1 }
  0x9c   :  { %v188_v27 = vadd.f32 %v187_v21, %v186_v15  ;;  %v193_v28 = vrot.slane %v192_v22, 1  ;;  %v168_v30 = vrot.slane %v167_v23, 1  ;;  %v163_v37 = vadd.f32 %v162_v33, %v161_v24 }
  0x9d   :  { %261 = vadd.xlane.f32.xlu1 %v254_v25  ;;  %v260_v29 = vadd.f32 %v259_v26, %v258_v18 }
  0x9e   :  { %195 = vadd.xlane.f32.xlu0 %v188_v27  ;;  %v194_v32 = vadd.f32 %v193_v28, %v192_v22  ;;  %v169_v35 = vadd.f32 %v168_v30, %v167_v23 }
  0xa1   :  { %263 = vadd.xlane.f32.xlu1 %v260_v29 }
  0xa2   :  { %197 = vadd.xlane.f32.xlu0 %v194_v32 }
  0xa5   :  { %172 = vadd.xlane.f32.xlu1 %v169_v35 }
  0xa6   :  { %170 = vadd.xlane.f32.xlu0 %v163_v37 }
  0xa9   :  { %287 = vadd.xlane.f32.xlu1 %v284_v39 }
  0xaa   :  { %285 = vadd.xlane.f32.xlu0 %v278_v40 }
 0x10e   :  { %v222_v43 = vpop.xlane.xlu1 %221 }
 0x10f   :  { %v224_v44 = vadd.f32 %v222_v43, %v204_v41 }
 0x111   :  { %226 = vst.msk [vmem:[#allocation16 + $0x1] sm:$0x1] %vm117_vm0, %v224_v44 }
 0x112   :  { %v220_v45 = vpop.xlane.xlu0 %219 }
 0x113   :  { %v223_v46 = vadd.f32 %v220_v45, %v203_v42 }
 0x115   :  { %225 = vst.msk [vmem:[#allocation16] sm:$0x1] %vm117_vm0, %v223_v46 }
 0x12a   :  { %v262_v49 = vpop.xlane.xlu1 %261 }
 0x12b   :  { %v265_v50 = vadd.f32 %v262_v49, %v241_v47  ;;  %v196_v51 = vpop.xlane.xlu0 %195 }
 0x12c   :  { %v199_v52 = vadd.f32 %v196_v51, %v179_v48 }
 0x12d   :  { %267 = vst.msk [vmem:[#allocation17] sm:$0x1] %vm117_vm0, %v265_v50 }
 0x12e   :  { %201 = vst.msk [vmem:[#allocation14] sm:$0x1] %vm117_vm0, %v199_v52  ;;  %v264_v55 = vpop.xlane.xlu1 %263 }
 0x12f   :  { %v266_v56 = vadd.f32 %v264_v55, %v242_v53  ;;  %v198_v57 = vpop.xlane.xlu0 %197 }
 0x130   :  { %v200_v58 = vadd.f32 %v198_v57, %v180_v54 }
 0x131   :  { %268 = vst.msk [vmem:[#allocation17 + $0x1] sm:$0x1] %vm117_vm0, %v266_v56 }
 0x132   :  { %202 = vst.msk [vmem:[#allocation14 + $0x1] sm:$0x1] %vm117_vm0, %v200_v58  ;;  %v173_v61 = vpop.xlane.xlu1 %172 }
 0x133   :  { %554 = shalt.err (!%p551_p10)
}
 0x134   :  { %s555_s12 = scalar_lea.hbm %s978_s9, 32 }
 0x135   :  { %p556_p11 = scmp.ne.s32.totalorder %s978_s9, %s555_s12  ;;  %p559_p12 = scmp.lt.u32.totalorder %s555_s12, %s978_s9 }
 0x137   :  { %p561_p13 = pnand %p559_p12, %p556_p11 }
 0x139   :  { %564 = shalt.err (!%p561_p13)
}
 0x13a   :  { %s680_s17 = smov 16   ;;  %s681_s18 = smov 1   ;;  %v175_v62 = vadd.f32 %v173_v61, %v155_v59  ;;  %v171_v63 = vpop.xlane.xlu0 %170 }
 0x13b   :  { %340 = dma.vmem_to_hbm [thread:$0]  %s335_s25, 32, %s978_s9, [#allocation18], %s680_s17, %s680_s17, %s681_s18  }
 0x13c   :  { %s565_s19 = scalar_lea.vmem %s867_s24, 32  ;;  %p570_p1 = scmp.lt.s32.totalorder %s867_s24, %s867_s24 }
 0x13d   :  { %p566_p0 = scmp.ne.s32.totalorder %s867_s24, %s565_s19  ;;  %p571_p2 = scmp.lt.s32.totalorder %s565_s19, %s565_s19 }
 0x13f   :  { %p572_p3 = por %p571_p2, %p570_p1 }
 0x141   :  { %p573_p4 = pnand %p572_p3, %p566_p0 }
 0x143   :  { %576 = shalt.err (!%p573_p4)
}
 0x144   :  { %s577_s20 = scalar_lea.hbm %s976_s7, 32 }
 0x145   :  { %p578_p5 = scmp.ne.s32.totalorder %s976_s7, %s577_s20  ;;  %p581_p6 = scmp.lt.u32.totalorder %s577_s20, %s976_s7 }
 0x147   :  { %p583_p7 = pnand %p581_p6, %p578_p5 }
 0x149   :  { %586 = shalt.err (!%p583_p7)
}
 0x14a   :  { %316 = dma.vmem_to_hbm [thread:$0]  %s867_s24, 32, %s976_s7, [#allocation15], %s680_s17, %s680_s17, %s681_s18   ;;  %v174_v0 = vadd.f32 %v171_v63, %v154_v60  ;;  %v270_v2 = vld [vmem:[#allocation19 + $0x1] sm:$0x1] }
 0x14b   :  { %s587_s27 = scalar_lea.vmem %s872_s30, 32  ;;  %p592_p9 = scmp.lt.s32.totalorder %s872_s30, %s872_s30 }
 0x14c   :  { %p588_p8 = scmp.ne.s32.totalorder %s872_s30, %s587_s27  ;;  %p593_p10 = scmp.lt.s32.totalorder %s587_s27, %s587_s27 }
 0x14e   :  { %p594_p11 = por %p593_p10, %p592_p9 }
 0x150   :  { %p595_p12 = pnand %p594_p11, %p588_p8 }
 0x152   :  { %598 = shalt.err (!%p595_p12)
}
 0x153   :  { %s599_s3 = scalar_lea.hbm %s977_s8, 32 }
 0x154   :  { %p600_p13 = scmp.ne.s32.totalorder %s977_s8, %s599_s3  ;;  %p603_p0 = scmp.lt.u32.totalorder %s599_s3, %s977_s8 }
 0x156   :  { %p605_p1 = pnand %p603_p0, %p600_p13 }
 0x158   :  { %608 = shalt.err (!%p605_p1)
}
 0x159   :  { %328 = dma.vmem_to_hbm [thread:$0]  %s872_s30, 32, %s977_s8, [#allocation15], %s680_s17, %s680_s17, %s681_s18   ;;  %178 = vst.msk [vmem:[#allocation13 + $0x1] sm:$0x1] %vm117_vm0, %v175_v62  ;;  %v269_v3 = vld [vmem:[#allocation19] sm:$0x1]  ;;  %v288_v4 = vpop.xlane.xlu1 %287  ;;  %v286_v6 = vpop.xlane.xlu0 %285 }
 0x15a   :  { %s682_s22 = smov [#allocation19]   ;;  %177 = vst.msk [vmem:[#allocation13] sm:$0x1] %vm117_vm0, %v174_v0  ;;  %v290_v5 = vadd.f32 %v288_v4, %v270_v2  ;;  %s609_s1 = scalar_lea.vmem %s869_s28, 32 }
 0x15b   :  { %s346_s15 = sshll.u32 %s682_s22, 4  ;;  %p610_p2 = scmp.ne.s32.totalorder %s869_s28, %s609_s1  ;;  %s347_s15 = int_to_ptr.vmem [resolvable:$true] %s346_s15 }
 0x15c   :  { %p614_p3 = scmp.lt.s32.totalorder %s869_s28, %s869_s28  ;;  %p615_p4 = scmp.lt.s32.totalorder %s609_s1, %s609_s1 }
 0x15e   :  { %p616_p5 = por %p615_p4, %p614_p3 }
 0x160   :  { %p617_p6 = pnand %p616_p5, %p610_p2 }
 0x162   :  { %620 = shalt.err (!%p617_p6)
}
 0x163   :  { %s621_s30 = scalar_lea.hbm %s975_s6, 32 }
 0x164   :  { %p622_p7 = scmp.ne.s32.totalorder %s975_s6, %s621_s30  ;;  %p625_p8 = scmp.lt.u32.totalorder %s621_s30, %s975_s6 }
 0x166   :  { %p627_p9 = pnand %p625_p8, %p622_p7 }
 0x168   :  { %630 = shalt.err (!%p627_p9)
}
 0x169   :  { %304 = dma.vmem_to_hbm [thread:$0]  %s869_s28, 32, %s975_s6, [#allocation4], %s680_s17, %s680_s17, %s681_s18   ;;  %v289_v7 = vadd.f32 %v286_v6, %v269_v3  ;;  %292 = vst.msk [vmem:[#allocation19 + $0x1] sm:$0x1] %vm117_vm0, %v290_v5 }
 0x16a   :  { %s631_s5 = scalar_lea.vmem %s347_s15, 32  ;;  %p636_p11 = scmp.lt.s32.totalorder %s347_s15, %s347_s15 }
 0x16b   :  { %291 = vst.msk [vmem:[#allocation19] sm:$0x1] %vm117_vm0, %v289_v7  ;;  %p632_p10 = scmp.ne.s32.totalorder %s347_s15, %s631_s5  ;;  %p637_p12 = scmp.lt.s32.totalorder %s631_s5, %s631_s5 }
 0x16d   :  { %p638_p13 = por %p637_p12, %p636_p11 }
 0x16f   :  { %p639_p0 = pnand %p638_p13, %p632_p10 }
 0x171   :  { %642 = shalt.err (!%p639_p0)
}
 0x172   :  { %s643_s26 = scalar_lea.hbm %s979_s10, 32 }
 0x173   :  { %p644_p1 = scmp.ne.s32.totalorder %s979_s10, %s643_s26  ;;  %p647_p2 = scmp.lt.u32.totalorder %s643_s26, %s979_s10 }
 0x175   :  { %p649_p3 = pnand %p647_p2, %p644_p1 }
 0x177   :  { %652 = shalt.err (!%p649_p3)
}
 0x178   :  { %352 = dma.vmem_to_hbm [thread:$0]  %s347_s15, 32, %s979_s10, [#allocation18], %s680_s17, %s680_s17, %s681_s18  }
 0x179   :  { %661 = dma.done.wait [#allocation4], 32  }
 0x17a   :  { %662 = vsyncadd [#allocation4], 4294967264 }
 0x17b   :  { %663 = dma.done.wait [#allocation15], 64  }
 0x17c   :  { %664 = vsyncadd [#allocation15], 4294967232 }
 0x17d   :  { %665 = dma.done.wait [#allocation18], 64  }
 0x17e   :  { %666 = vsyncadd [#allocation18], 4294967232 }
 0x17f   :  { %368 = vsyncpa [#allocation3], 1 }
 0x180   :  { %369 = vsyncpa [#allocation6], 1 }
 0x181   :  { %370 = vsyncpa [#allocation9], 1 }
 0x182   :  { %371 = vsyncpa [#allocation12], 1 }
 0x183   :  { %372 = vsyncpa [#allocation4], 1 }
 0x184   :  { %373 = vsyncpa [#allocation15], 1 }
 0x185   :  { %374 = vsyncpa [#allocation18], 1 }

</bundles_post_ra>
